<compile_context>
chip_gen: v7x
topology: tpu7x:2x2x1
jax: 0.10.0
libtpu: 0.0.40
codegen_flags: <defaults>
</compile_context>

<pallas_src>
import functools
import math

import jax
import jax.numpy as jnp
from jax import lax
from jax.experimental import pallas as pl
from jax.experimental.pallas import tpu as pltpu


def _round_up(a, b):
    return -(-a // b) * b


# ---------------------------------------------------------------------------
# Kernel 1: batch-independent GCN branch (runs once, single grid point).
# Produces g = gc2(LeakyReLU(gc1(word2vec, adj)), adj), zero-padded to
# (NCp, C) so the classifier's resident block is lane-dense with no XLA pad.
# ---------------------------------------------------------------------------
def gcn_embedding_kernel(a_ref, wv_ref, w1_ref, w2_ref, g_ref):
    A = a_ref[...]
    nc = a_ref.shape[0]
    # gen_adj(A): d = A.sum(1)^-0.5 ; adj = D @ A.T @ D  (D = diag(d)).
    # No epsilon, matching torch.pow(A.sum(1), -0.5); A is built with +I so
    # row sums are strictly positive.
    d = lax.rsqrt(jnp.sum(A, axis=1))          # EUP rsqrt

    def adj_matmul(s):
        # adj @ s == d[:,None] * (A.T @ (d[:,None] * s)); contract A over its
        # FIRST axis so A.T is never materialized (no explicit transpose).
        return d[:, None] * lax.dot_general(
            A, d[:, None] * s,
            dimension_numbers=(((0,), (0,)), ((), ())),
            preferred_element_type=jnp.float32)

    # gc1: adj @ (word2vec @ W1)
    g = adj_matmul(jnp.dot(wv_ref[...], w1_ref[...],
                           preferred_element_type=jnp.float32))
    # LeakyReLU(0.2)
    g = jnp.where(g >= 0, g, 0.2 * g)
    # gc2: adj @ (g @ W2)
    g = adj_matmul(jnp.dot(g, w2_ref[...],
                           preferred_element_type=jnp.float32))
    # Emit g already padded: zero class rows -> zero score columns (sliced
    # off in the wrapper).
    ncp = g_ref.shape[0]
    if ncp != nc:
        g = jnp.concatenate(
            [g, jnp.zeros((ncp - nc, g.shape[1]), jnp.float32)], axis=0)
    g_ref[...] = g


# ---------------------------------------------------------------------------
# Kernel 2: streaming avg-pool + classifier over the batch grid.
#   x_ref  : (tb, C, HW)  -- NATIVE NCHW layout (no wrapper transpose)
#   g_ref  : (NCp, C)     -- resident across all grid steps (constant block)
#   out_ref: (tb, NCp)    -- lane-dense output tile
# ---------------------------------------------------------------------------
def pool_classify_kernel(x_ref, g_ref, out_ref, *, inv_hw):
    # Average pool over spatial (lane axis); f32 accumulation.  The XLU
    # reduce is off the critical path: the kernel is HBM-bound.
    x = jnp.sum(x_ref[...].astype(jnp.float32), axis=-1) * inv_hw   # (tb, C)
    # Classifier x @ g.T without materializing the transpose.
    out_ref[...] = lax.dot_general(
        x, g_ref[...],
        dimension_numbers=(((1,), (1,)), ((), ())),
        preferred_element_type=jnp.float32)


# ---------------------------------------------------------------------------
# Wrapper
# ---------------------------------------------------------------------------
def gcn_head_forward(x_nchw, A, word2vec, w1, w2, *,
                     batch_block=None,
                     x_block_budget_bytes=None,
                     vmem_clamp_bytes=None):
    """x_nchw: (B, C, H, W). Returns cls_score (B, num_classes) float32."""
    B, C, H, W = x_nchw.shape
    NC, W2V = word2vec.shape
    MID = w1.shape[1]
    assert w1.shape == (W2V, MID)
    assert w2.shape == (MID, C)
    assert A.shape == (NC, NC)
    HW = H * W
    NCp = _round_up(NC, 128)

    # ---- batch-independent GCN branch: one tiny single-shot pallas_call ----
    full = lambda shape: pl.BlockSpec(shape, lambda: (0,) * len(shape))
    g = pl.pallas_call(
        gcn_embedding_kernel,
        out_shape=jax.ShapeDtypeStruct((NCp, C), jnp.float32),
        grid=(),
        in_specs=[full((NC, NC)), full((NC, W2V)),
                  full((W2V, MID)), full((MID, C))],
        out_specs=full((NCp, C)),
    )(A, word2vec, w1, w2)

    # ---- x stays in its native layout: (B,C,H,W)->(B,C,HW) is free.  No
    # transpose, no pad, no cast: exactly one HBM read of the feature map. ----
    x_stream = x_nchw.reshape(B, C, HW)

    # ---- per-generation VMEM budgets (128 MiB on v5e/v6e, 64 MiB on v7x) ----
    try:
        vmem_cap = int(pltpu.get_tpu_info().vmem_capacity_bytes)
    except Exception:
        vmem_cap = 64 << 20                        # conservative (v7x) fallback
    big_vmem = vmem_cap >= (100 << 20)
    if x_block_budget_bytes is None:
        x_block_budget_bytes = (24 << 20) if big_vmem else (10 << 20)
    if vmem_clamp_bytes is None:
        vmem_clamp_bytes = (96 << 20) if big_vmem else (40 << 20)

    itemsize = jnp.dtype(x_stream.dtype).itemsize
    per_sample_hbm = C * HW * itemsize
    # VMEM tile is lane/sublane padded: (tb, round_up(C,8), round_up(HW,128)).
    per_sample_vmem = _round_up(C, 8) * _round_up(HW, 128) * itemsize
    g_vmem = 2 * _round_up(NCp, 8) * _round_up(C, 128) * 4
    out_row_vmem = NCp * 4
    headroom = 4 << 20

    def vmem_need(n_x_bufs, t):
        return n_x_bufs * t * per_sample_vmem + g_vmem + 2 * t * out_row_vmem

    # ---- batch tile selection ----
    cap = max(1, x_block_budget_bytes // per_sample_vmem)
    if B >= 16:
        # Guarantee >=2 grid steps so dimension_semantics=("parallel",)
        # actually shards the batch across v7x's two TensorCores.
        cap = min(cap, max(8, ((-(-B // 2)) // 8) * 8))
    if batch_block is not None:
        cap = min(cap, batch_block)

    if B < 16 and B <= cap:
        tb = B                                     # single full-batch block
    else:
        tb = max(8, (min(cap, max(B, 8)) // 8) * 8)
        # Never exceed the clamp: shrink until the double-buffered stream,
        # resident g and output tiles all fit (v7x 64-MiB safety).
        while tb > 8 and vmem_need(2, tb) + headroom > vmem_clamp_bytes:
            tb -= 8
        if B < tb:
            tb = B
    grid_steps = pl.cdiv(B, tb)        # last partial block is masked by Pallas

    # Deepen the x pipeline when per-step DMAs are small (latency hiding on
    # v7x's 3.2 TB/s HBM); only if the extra buffer still fits the clamp.
    n_x_bufs = 2
    if (tb * per_sample_hbm < (2 << 20) and grid_steps >= 3
            and vmem_need(3, tb) + headroom <= vmem_clamp_bytes):
        n_x_bufs = 3

    x_spec = pl.BlockSpec((tb, C, HW), lambda i: (i, 0, 0))
    if n_x_bufs > 2:
        try:
            x_spec = pl.BlockSpec((tb, C, HW), lambda i: (i, 0, 0),
                                  pipeline_mode=pl.Buffered(n_x_bufs))
        except TypeError:              # older BlockSpec without pipeline_mode
            n_x_bufs = 2

    need = vmem_need(n_x_bufs, tb)
    vmem_limit = int(min(max(need + headroom, 16 << 20), vmem_clamp_bytes))
    vmem_limit = int(max(vmem_limit, need + (1 << 20)))  # never starve buffers

    out = pl.pallas_call(
        functools.partial(pool_classify_kernel, inv_hw=1.0 / HW),
        out_shape=jax.ShapeDtypeStruct((B, NCp), jnp.float32),
        grid=(grid_steps,),
        in_specs=[
            x_spec,
            pl.BlockSpec((NCp, C), lambda i: (0, 0)),   # constant -> resident
        ],
        out_specs=pl.BlockSpec((tb, NCp), lambda i: (i, 0)),
        compiler_params=pltpu.CompilerParams(
            dimension_semantics=("parallel",),
            vmem_limit_bytes=vmem_limit),
    )(x_stream, g)

    return out[:, :NC]


# ---------------------------------------------------------------------------
# Pure-JAX reference (mirrors the PyTorch forward)
# ---------------------------------------------------------------------------
def reference_forward(x_nchw, A, word2vec, w1, w2):
    x = jnp.mean(x_nchw, axis=(2, 3))
    d = jnp.power(jnp.sum(A, axis=1), -0.5)
    adj = (A @ jnp.diag(d)).T @ jnp.diag(d)
    g = adj @ (word2vec @ w1)
    g = jnp.where(g >= 0, g, 0.2 * g)
    g = adj @ (g @ w2)
    return x @ g.T


if __name__ == "__main__":
    # Small, forward-consistent shapes (C multiple of 128 for lane density).
    B, C, H, W = 32, 128, 4, 4        # in_channels = 128
    NC = 16                           # num_classes
    W2V = 32                          # word2vec_len
    MID = 64                          # mid_channels

    key = jax.random.PRNGKey(0)
    kx, ka, kwv, kw1, kw2 = jax.random.split(key, 5)

    # Feature map (NCHW, like the PyTorch module input).
    x = jax.random.normal(kx, (B, C, H, W), dtype=jnp.float32)

    # Synthetic adjacency (stand-in for gen_A output): non-negative, with
    # identity added so row sums are strictly positive (as in gen_A).
    A_rand = jax.random.uniform(ka, (NC, NC), dtype=jnp.float32)
    A_bin = (A_rand > 0.6).astype(jnp.float32)
    A = A_bin * 0.25 / (jnp.sum(A_bin, axis=0) + 1e-6) + jnp.eye(NC, dtype=jnp.float32)

    # Synthetic word2vec embeddings (stand-in for glove pickle).
    word2vec = jax.random.normal(kwv, (NC, W2V), dtype=jnp.float32)

    # GraphConvolution weights: uniform(-stdv, stdv), stdv = 1/sqrt(out_features).
    stdv1 = 1.0 / math.sqrt(MID)
    w1 = jax.random.uniform(kw1, (W2V, MID), minval=-stdv1, maxval=stdv1,
                            dtype=jnp.float32)
    stdv2 = 1.0 / math.sqrt(C)
    w2 = jax.random.uniform(kw2, (MID, C), minval=-stdv2, maxval=stdv2,
                            dtype=jnp.float32)

    # batch_block=8 -> 4 grid steps: exercises the pipelined batch loop,
    # megacore batch sharding and the deepened x pipeline.
    cls_score = gcn_head_forward(x, A, word2vec, w1, w2, batch_block=8)
    cls_score = jax.block_until_ready(cls_score)

    ref = reference_forward(x, A, word2vec, w1, w2)
    assert cls_score.shape == (B, NC)
    assert jnp.allclose(cls_score, ref, atol=1e-4, rtol=1e-4)

    print("KERNEL_OK")
</pallas_src>

<mosaic_0001>
module attributes {stable_mosaic.version = 11 : i64} {
  func.func @gcn_embedding_kernel(%arg0: memref<16x16xf32, #tpu.memory_space<vmem>>, %arg1: memref<16x32xf32, #tpu.memory_space<vmem>>, %arg2: memref<32x64xf32, #tpu.memory_space<vmem>>, %arg3: memref<64x128xf32, #tpu.memory_space<vmem>>, %arg4: memref<128x128xf32, #tpu.memory_space<vmem>>) attributes {dimension_semantics = [], scalar_prefetch = 0 : i64, scratch_operands = 0 : i64, tpu.core_type = #tpu.core_type<tc>} {
    %c0 = arith.constant 0 : index
    %c0_0 = arith.constant 0 : index
    %0 = vector.load %arg0[%c0, %c0_0] : memref<16x16xf32, #tpu.memory_space<vmem>>, vector<16x16xf32>
    %cst = arith.constant dense<0.000000e+00> : vector<16xf32>
    %1 = vector.multi_reduction <add>, %0, %cst [1] : vector<16x16xf32> to vector<16xf32>
    %2 = math.rsqrt %1 : vector<16xf32>
    %c0_1 = arith.constant 0 : index
    %c0_2 = arith.constant 0 : index
    %3 = vector.load %arg1[%c0_1, %c0_2] : memref<16x32xf32, #tpu.memory_space<vmem>>, vector<16x32xf32>
    %c0_3 = arith.constant 0 : index
    %c0_4 = arith.constant 0 : index
    %4 = vector.load %arg2[%c0_3, %c0_4] : memref<32x64xf32, #tpu.memory_space<vmem>>, vector<32x64xf32>
    %cst_5 = arith.constant dense<0.000000e+00> : vector<16x64xf32>
    %5 = tpu.matmul %3, %4, %cst_5 {dimension_numbers = #tpu.dot_dimension_numbers<[1], [0], [0], [1], [0, 0, 1, 1], [], []>} : vector<16x32xf32>, vector<32x64xf32>, vector<16x64xf32> -> vector<16x64xf32>
    %6 = vector.shape_cast %2 : vector<16xf32> to vector<16x1xf32>
    %7 = vector.shape_cast %2 : vector<16xf32> to vector<16x1xf32>
    %8 = vector.broadcast %7 : vector<16x1xf32> to vector<16x64xf32>
    %9 = arith.mulf %8, %5 : vector<16x64xf32>
    %cst_6 = arith.constant dense<0.000000e+00> : vector<16x64xf32>
    %10 = tpu.matmul %0, %9, %cst_6 {dimension_numbers = #tpu.dot_dimension_numbers<[0], [0], [1], [1], [0, 1, 1, 1], [], []>} : vector<16x16xf32>, vector<16x64xf32>, vector<16x64xf32> -> vector<16x64xf32>
    %11 = vector.broadcast %6 : vector<16x1xf32> to vector<16x64xf32>
    %12 = arith.mulf %11, %10 : vector<16x64xf32>
    %cst_7 = arith.constant 0.000000e+00 : f32
    %13 = vector.broadcast %cst_7 : f32 to vector<16x64xf32>
    %14 = arith.cmpf oge, %12, %13 : vector<16x64xf32>
    %cst_8 = arith.constant 2.000000e-01 : f32
    %15 = vector.broadcast %cst_8 : f32 to vector<16x64xf32>
    %16 = arith.mulf %15, %12 : vector<16x64xf32>
    %17 = arith.select %14, %12, %16 : vector<16x64xi1>, vector<16x64xf32>
    %c0_9 = arith.constant 0 : index
    %c0_10 = arith.constant 0 : index
    %18 = vector.load %arg3[%c0_9, %c0_10] : memref<64x128xf32, #tpu.memory_space<vmem>>, vector<64x128xf32>
    %cst_11 = arith.constant dense<0.000000e+00> : vector<16x128xf32>
    %19 = tpu.matmul %17, %18, %cst_11 {dimension_numbers = #tpu.dot_dimension_numbers<[1], [0], [0], [1], [0, 0, 1, 1], [], []>} : vector<16x64xf32>, vector<64x128xf32>, vector<16x128xf32> -> vector<16x128xf32>
    %20 = vector.shape_cast %2 : vector<16xf32> to vector<16x1xf32>
    %21 = vector.shape_cast %2 : vector<16xf32> to vector<16x1xf32>
    %22 = vector.broadcast %21 : vector<16x1xf32> to vector<16x128xf32>
    %23 = arith.mulf %22, %19 : vector<16x128xf32>
    %cst_12 = arith.constant dense<0.000000e+00> : vector<16x128xf32>
    %24 = tpu.matmul %0, %23, %cst_12 {dimension_numbers = #tpu.dot_dimension_numbers<[0], [0], [1], [1], [0, 1, 1, 1], [], []>} : vector<16x16xf32>, vector<16x128xf32>, vector<16x128xf32> -> vector<16x128xf32>
    %25 = vector.broadcast %20 : vector<16x1xf32> to vector<16x128xf32>
    %26 = arith.mulf %25, %24 : vector<16x128xf32>
    %cst_13 = arith.constant 0.000000e+00 : f32
    %27 = vector.broadcast %cst_13 : f32 to vector<112x128xf32>
    %28 = tpu.concatenate %26, %27 in 0 : vector<16x128xf32>, vector<112x128xf32> -> vector<128x128xf32>
    %c0_14 = arith.constant 0 : index
    %c0_15 = arith.constant 0 : index
    %29 = vector.load %arg4[%c0_14, %c0_15] : memref<128x128xf32, #tpu.memory_space<vmem>>, vector<128x128xf32>
    tpu.vector_store %arg4[%c0_14, %c0_15], %28 {strides = array<i32>} : memref<128x128xf32, #tpu.memory_space<vmem>>, vector<128x128xf32>,
    return
  }
}

</mosaic_0001>

<bundles_post_ra>
// kernel: tpu_custom_call.1
= control target key start
LH: loop header
LB: loop body
LE: loop exit
PB: predicated region body
PF: predicated region fallthrough
CT: control target
= control target key end

     0   :  { %9 = vsyncpa [#allocation3], 0  ;;  %s867_s0 = inlined_call_operand.hbm [shape: f32[16,16], index: 0, kind: input, shape index: {}]   ;;  %s868_s1 = inlined_call_operand.hbm [shape: f32[16,32], index: 1, kind: input, shape index: {}]   ;;  %s869_s2 = inlined_call_operand.hbm [shape: f32[32,64], index: 2, kind: input, shape index: {}]   ;;  %s870_s3 = inlined_call_operand.hbm [shape: f32[64,128], index: 3, kind: input, shape index: {}]   ;;  %s871_s4 = inlined_call_operand.hbm [shape: f32[128,128], index: 4, kind: output, shape index: {}]  }
   0x1   :  { %10 = vsyncpa [#allocation6], 0 }
   0x2   :  { %11 = vsyncpa [#allocation9], 0 }
   0x3   :  { %12 = vsyncpa [#allocation4], 0  ;;  %s737_s15 = smov [#allocation5]   ;;  %s738_s17 = smov [#allocation2]  }
   0x4   :  { %s30_s16 = sshll.u32 %s737_s15, 4  ;;  %s18_s18 = sshll.u32 %s738_s17, 4  ;;  %s31_s16 = int_to_ptr.vmem [resolvable:$true] %s30_s16  ;;  %s770_s18 = int_to_ptr.vmem [resolvable:$true] %s18_s18 }
   0x5   :  { %s619_s21 = scalar_lea.hbm %s868_s1, 256 }
   0x6   :  { %p620_p0 = scmp.ne.s32.totalorder %s868_s1, %s619_s21  ;;  %p623_p1 = scmp.lt.u32.totalorder %s619_s21, %s868_s1 }
   0x8   :  { %p625_p2 = pnand %p623_p1, %p620_p0 }
   0xa   :  { %628 = shalt.err (!%p625_p2)
}
   0xb   :  { %s629_s26 = scalar_lea.vmem %s31_s16, 256  ;;  %p634_p4 = scmp.lt.s32.totalorder %s31_s16, %s31_s16 }
   0xc   :  { %p630_p3 = scmp.ne.s32.totalorder %s31_s16, %s629_s26  ;;  %p635_p5 = scmp.lt.s32.totalorder %s629_s26, %s629_s26 }
   0xe   :  { %p636_p6 = por %p635_p5, %p634_p4 }
  0x10   :  { %p637_p7 = pnand %p636_p6, %p630_p3 }
  0x12   :  { %640 = shalt.err (!%p637_p7)
}
  0x13   :  { %s739_s27 = smov 128   ;;  %s740_s28 = smov 8  }
  0x14   :  { %36 = dma.hbm_to_vmem [thread:$0]  %s868_s1, 256, %s31_s16, [#allocation6], %s739_s27, %s739_s27, %s740_s28  }
  0x15   :  { %s641_s7 = scalar_lea.hbm %s867_s0, 256 }
  0x16   :  { %p642_p8 = scmp.ne.s32.totalorder %s867_s0, %s641_s7  ;;  %p645_p9 = scmp.lt.u32.totalorder %s641_s7, %s867_s0 }
  0x18   :  { %p647_p10 = pnand %p645_p9, %p642_p8 }
  0x1a   :  { %650 = shalt.err (!%p647_p10)
}
  0x1b   :  { %s651_s12 = scalar_lea.vmem %s770_s18, 256  ;;  %p656_p12 = scmp.lt.s32.totalorder %s770_s18, %s770_s18 }
  0x1c   :  { %p652_p11 = scmp.ne.s32.totalorder %s770_s18, %s651_s12  ;;  %p657_p13 = scmp.lt.s32.totalorder %s651_s12, %s651_s12 }
  0x1e   :  { %p658_p0 = por %p657_p13, %p656_p12 }
  0x20   :  { %p659_p1 = pnand %p658_p0, %p652_p11 }
  0x22   :  { %662 = shalt.err (!%p659_p1)
}
  0x23   :  { %24 = dma.hbm_to_vmem [thread:$0]  %s867_s0, 256, %s770_s18, [#allocation3], %s739_s27, %s739_s27, %s740_s28  }
  0x24   :  { %s741_s14 = smov [#allocation7]   ;;  %s742_s16 = smov [#allocation8]  }
  0x25   :  { %s42_s15 = sshll.u32 %s741_s14, 4  ;;  %s54_s17 = sshll.u32 %s742_s16, 4  ;;  %s43_s15 = int_to_ptr.vmem [resolvable:$true] %s42_s15  ;;  %s807_s17 = int_to_ptr.vmem [resolvable:$true] %s54_s17 }
  0x26   :  { %s663_s21 = scalar_lea.hbm %s869_s2, 512 }
  0x27   :  { %p664_p2 = scmp.ne.s32.totalorder %s869_s2, %s663_s21  ;;  %p667_p3 = scmp.lt.u32.totalorder %s663_s21, %s869_s2 }
  0x29   :  { %p669_p4 = pnand %p667_p3, %p664_p2 }
  0x2b   :  { %672 = shalt.err (!%p669_p4)
}
  0x2c   :  { %s673_s0 = scalar_lea.vmem %s43_s15, 512  ;;  %p678_p6 = scmp.lt.s32.totalorder %s43_s15, %s43_s15 }
  0x2d   :  { %p674_p5 = scmp.ne.s32.totalorder %s43_s15, %s673_s0  ;;  %p679_p7 = scmp.lt.s32.totalorder %s673_s0, %s673_s0 }
  0x2f   :  { %p680_p8 = por %p679_p7, %p678_p6 }
  0x31   :  { %p681_p9 = pnand %p680_p8, %p674_p5 }
  0x33   :  { %684 = shalt.err (!%p681_p9)
}
  0x34   :  { %48 = dma.hbm_to_vmem [thread:$0]  %s869_s2, 512, %s43_s15, [#allocation6], %s739_s27, %s739_s27, %s740_s28  }
  0x35   :  { %s685_s5 = scalar_lea.hbm %s870_s3, 1024 }
  0x36   :  { %p686_p10 = scmp.ne.s32.totalorder %s870_s3, %s685_s5  ;;  %p689_p11 = scmp.lt.u32.totalorder %s685_s5, %s870_s3 }
  0x38   :  { %p691_p12 = pnand %p689_p11, %p686_p10 }
  0x3a   :  { %694 = shalt.err (!%p691_p12)
}
  0x3b   :  { %s695_s10 = scalar_lea.vmem %s807_s17, 1024  ;;  %p700_p0 = scmp.lt.s32.totalorder %s807_s17, %s807_s17 }
  0x3c   :  { %p696_p13 = scmp.ne.s32.totalorder %s807_s17, %s695_s10  ;;  %p701_p1 = scmp.lt.s32.totalorder %s695_s10, %s695_s10 }
  0x3e   :  { %p702_p2 = por %p701_p1, %p700_p0 }
  0x40   :  { %p703_p3 = pnand %p702_p2, %p696_p13 }
  0x42   :  { %706 = shalt.err (!%p703_p3)
}
  0x43   :  { %60 = dma.hbm_to_vmem [thread:$0]  %s870_s3, 1024, %s807_s17, [#allocation9], %s739_s27, %s739_s27, %s740_s28  }
  0x44   :  { %729 = dma.done.wait [#allocation3], 256  }
  0x45   :  { %730 = vsyncadd [#allocation3], 4294967040 }
  0x46   :  { %731 = dma.done.wait [#allocation6], 768  }
  0x47   :  { %732 = vsyncadd [#allocation6], 4294966528 }
  0x48   :  { %733 = dma.done.wait [#allocation9], 1024  }
  0x49   :  { %734 = vsyncadd [#allocation9], 4294966272  ;;  %vm90_vm0 = vcmask 261120   ;;  %v86_v0 = vld [vmem:[#allocation7] sm:$0xff]  ;;  %v87_v1 = vld [vmem:[#allocation7 + $0x8] sm:$0xff]  ;;  %vm75_vm1 = vcmask 130048  }
  0x4a   :  { %v88_v2 = vld [vmem:[#allocation7 + $0x10] sm:$0xff]  ;;  %v575_v3 = vpack.c.bf16 %v87_v1, %v86_v0  ;;  %v89_v4 = vld [vmem:[#allocation7 + $0x18] sm:$0xff]  ;;  %v73_v7 = vld [vmem:[#allocation2] sm:$0xff]  ;;  %vm303_vm4 = vcmask 523264   ;;  %v743_v48 = vmov 0.0   ;;  %s744_s3 = smov [#allocation10]  }
  0x4b   :  { %v84_v5 = vld [vmem:[#allocation5] sm:$0xff]  ;;  %v579_v6 = vpack.c.bf16 %v89_v4, %v88_v2  ;;  %v74_v8 = vld [vmem:[#allocation2 + $0x8] sm:$0xff]  ;;  %v76_v9 = vsel %vm75_vm1, %v73_v7, 0.0  ;;  %174 = vxpose.xlu1.b32.start [1/2] (short) (narrow) %v73_v7, 16  ;;  %v85_v11 = vld [vmem:[#allocation5 + $0x8] sm:$0xff]  ;;  %466 = vst [vmem:[#allocation10 + $0x10] sm:$0xff] %v743_v48 }
  0x4c   :  { %539 = vmatprep.mubr.msk.f32.mxu0 %vm90_vm0, %v84_v5  ;;  %576 = vmatprep.subr.bf16.mxu0 %v575_v3  ;;  %v79_v10 = vsel %vm75_vm1, %v74_v8, 0.0  ;;  %v295_v12 = vld [vmem:[#allocation8] sm:$0xff]  ;;  %v296_v13 = vld [vmem:[#allocation8 + $0x8] sm:$0xff]  ;;  %v297_v14 = vld [vmem:[#allocation8 + $0x10] sm:$0xff]  ;;  %467 = vst [vmem:[#allocation10 + $0x18] sm:$0xff] %v743_v48  ;;  %s485_s12 = sshll.u32 %s744_s3, 4  ;;  %s486_s12 = int_to_ptr.vmem [resolvable:$true] %s485_s12 }
  0x4d   :  { %578 = vmatpush3.bf16.msra.mxu0 %v575_v3  ;;  %77 = vadd.xlane.f32.xlu0 %v76_v9  ;;  %v587_v15 = vpack.c.bf16 %v296_v13, %v295_v12  ;;  %v298_v16 = vld [vmem:[#allocation8 + $0x18] sm:$0xff]  ;;  %v299_v29 = vld [vmem:[#allocation8 + $0x20] sm:$0xff]  ;;  %v300_v30 = vld [vmem:[#allocation8 + $0x28] sm:$0xff]  ;;  %468 = vst [vmem:[#allocation10 + $0x20] sm:$0xff] %v743_v48  ;;  %s707_s1 = scalar_lea.vmem %s486_s12, 2048  ;;  %p712_p5 = scmp.lt.s32.totalorder %s486_s12, %s486_s12 }
  0x4e   :  { %580 = vmatprep.subr.bf16.mxu0 %v579_v6  ;;  %v591_v17 = vpack.c.bf16 %v298_v16, %v297_v14  ;;  %v595_v31 = vpack.c.bf16 %v300_v30, %v299_v29  ;;  %v301_v32 = vld [vmem:[#allocation8 + $0x30] sm:$0xff]  ;;  %v302_v33 = vld [vmem:[#allocation8 + $0x38] sm:$0xff]  ;;  %469 = vst [vmem:[#allocation10 + $0x28] sm:$0xff] %v743_v48  ;;  %470 = vst [vmem:[#allocation10 + $0x30] sm:$0xff] %v743_v48  ;;  %p708_p4 = scmp.ne.s32.totalorder %s486_s12, %s707_s1  ;;  %p713_p6 = scmp.lt.s32.totalorder %s707_s1, %s707_s1 }
  0x4f   :  { %175 = vxpose.xlu1.b32.end [2/2] (short) (narrow) %v74_v8, 16  ;;  %588 = vmatprep.subr.bf16.mxu1 %v587_v15  ;;  %v599_v34 = vpack.c.bf16 %v302_v33, %v301_v32  ;;  %471 = vst [vmem:[#allocation10 + $0x38] sm:$0xff] %v743_v48  ;;  %472 = vst [vmem:[#allocation10 + $0x40] sm:$0xff] %v743_v48 }
  0x50   :  { %590 = vmatpush3.bf16.msra.mxu1 %v587_v15  ;;  %473 = vst [vmem:[#allocation10 + $0x48] sm:$0xff] %v743_v48  ;;  %474 = vst [vmem:[#allocation10 + $0x50] sm:$0xff] %v743_v48  ;;  %p714_p7 = por %p713_p6, %p712_p5 }
  0x51   :  { %582 = vmatpush3.bf16.msra.mxu0 %v579_v6  ;;  %80 = vadd.xlane.f32.xlu0 %v79_v10  ;;  %475 = vst [vmem:[#allocation10 + $0x58] sm:$0xff] %v743_v48  ;;  %476 = vst [vmem:[#allocation10 + $0x60] sm:$0xff] %v743_v48 }
  0x52   :  { %592 = vmatprep.subr.bf16.mxu1 %v591_v17  ;;  %477 = vst [vmem:[#allocation10 + $0x68] sm:$0xff] %v743_v48  ;;  %478 = vst [vmem:[#allocation10 + $0x70] sm:$0xff] %v743_v48  ;;  %p715_p8 = pnand %p714_p7, %p708_p4 }
  0x53   :  { %479 = vst [vmem:[#allocation10 + $0x78] sm:$0xff] %v743_v48 }
  0x54   :  { %540 = vmatmul.mubr.msk.f32.vlgmr.msra.gmra.mrb[0].mxu0 %vm90_vm0, %v85_v11  ;;  %594 = vmatpush3.bf16.msra.mxu1 %v591_v17 }
  0x55   :  { %596 = vmatprep.subr.bf16.mxu1 %v595_v31 }
  0x58   :  { %598 = vmatpush3.bf16.msra.mxu1 %v595_v31 }
  0x59   :  { %600 = vmatprep.subr.bf16.mxu1 %v599_v34 }
  0x5c   :  { %602 = vmatpush3.bf16.msra.mxu1 %v599_v34 }
  0xcb   :  { %v190_v18 = vpop.trf.xlu1 }
  0xcc   :  { %546 = vmatprep.mubr.msk.f32.mxu0 %vm75_vm1, %v190_v18 }
  0xcf   :  { %v191_v28 = vpop.trf.xlu1 }
  0xda   :  { %v78_v19 = vpop.xlane.xlu0 %77 }
  0xde   :  { %v81_v20 = vpop.xlane.xlu0 %80 }
  0xdf   :  { %615 = vrsqrt.f32 %v81_v20 }
  0xe0   :  { %617 = vrsqrt.f32 %v78_v19 }
  0xe9   :  { %v616_v21 = vpop.eup %615 }
  0xea   :  { %v618_v23 = vpop.eup %617 }
 0x127   :  { %v541_v22 = vpop.f32.mrb[0].mxu0 }
 0x128   :  { %v173_v24 = vmul.f32 %v616_v21, %v541_v22  ;;  %v163_v25 = vpop.f32.mrb[1].mxu0 }
 0x129   :  { %v172_v26 = vmul.f32 %v618_v23, %v163_v25 }
 0x12b   :  { %v583_v27 = vpack.c.bf16 %v173_v24, %v172_v26 }
 0x12d   :  { %584 = vmatprep.subr.bf16.mxu0 %v583_v27 }
 0x12e   :  { %586 = vmatpush3.bf16.msra.mxu0 %v583_v27 }
 0x131   :  { %547 = vmatmul.mubr.msk.f32.vlgmr.msra.gmra.mrb[2].mxu0 %vm75_vm1, %v191_v28 }
 0x132   :  { %572 = vmatprep.mubr.msk.f32.mxu0 %vm75_vm1, %v190_v18 }
 0x204   :  { %v548_v35 = vpop.f32.mrb[2].mxu0 }
 0x205   :  { %v288_v36 = vmul.f32 %v616_v21, %v548_v35  ;;  %v278_v37 = vpop.f32.mrb[3].mxu0 }
 0x206   :  { %v287_v38 = vmul.f32 %v618_v23, %v278_v37 }
 0x207   :  { %v292_v39 = vmul.f32 0.2, %v288_v36  ;;  %vm290_vm2 = vcmp.ge.f32.partialorder %v288_v36, 0.0 }
 0x208   :  { %vm289_vm3 = vcmp.ge.f32.partialorder %v287_v38, 0.0  ;;  %v291_v40 = vmul.f32 0.2, %v287_v38 }
 0x209   :  { %v294_v42 = vsel %vm290_vm2, %v288_v36, %v292_v39 }
 0x20a   :  { %v293_v41 = vsel %vm289_vm3, %v287_v38, %v291_v40 }
 0x20b   :  { %565 = vmatprep.mubr.msk.f32.mxu1 %vm303_vm4, %v293_v41 }
 0x20c   :  { %566 = vmatmul.mubr.msk.f32.vlgmr.msra.gmra.mrb[0].mxu1 %vm303_vm4, %v294_v42 }
 0x2df   :  { %v567_v43 = vpop.f32.mrb[0].mxu1 }
 0x2e0   :  { %v386_v44 = vmul.f32 %v616_v21, %v567_v43  ;;  %v376_v45 = vpop.f32.mrb[1].mxu1 }
 0x2e1   :  { %v385_v46 = vmul.f32 %v618_v23, %v376_v45 }
 0x2e3   :  { %v603_v47 = vpack.c.bf16 %v386_v44, %v385_v46 }
 0x2e5   :  { %604 = vmatprep.subr.bf16.mxu0 %v603_v47 }
 0x2e6   :  { %606 = vmatpush3.bf16.msra.mxu0 %v603_v47 }
 0x2e9   :  { %573 = vmatmul.mubr.msk.f32.vlgmr.msra.gmra.mrb[4].mxu0 %vm75_vm1, %v191_v28 }
 0x3bc   :  { %v574_v49 = vpop.f32.mrb[4].mxu0 }
 0x3bd   :  { %v463_v50 = vmul.f32 %v616_v21, %v574_v49  ;;  %v453_v51 = vpop.f32.mrb[5].mxu0 }
 0x3be   :  { %v462_v52 = vmul.f32 %v618_v23, %v453_v51 }
 0x3bf   :  { %465 = vst [vmem:[#allocation10 + $0x8] sm:$0xff] %v463_v50 }
 0x3c0   :  { %464 = vst [vmem:[#allocation10] sm:$0xff] %v462_v52 }
 0x3c1   :  { %718 = shalt.err (!%p715_p8)
}
 0x3c2   :  { %s719_s15 = scalar_lea.hbm %s871_s4, 2048 }
 0x3c3   :  { %p720_p9 = scmp.ne.s32.totalorder %s871_s4, %s719_s15  ;;  %p723_p10 = scmp.lt.u32.totalorder %s719_s15, %s871_s4 }
 0x3c5   :  { %p725_p11 = pnand %p723_p10, %p720_p9 }
 0x3c7   :  { %728 = shalt.err (!%p725_p11)
}
 0x3c8   :  { %491 = dma.vmem_to_hbm [thread:$0]  %s486_s12, 2048, %s871_s4, [#allocation4], %s739_s27, %s739_s27, %s740_s28  }
 0x3c9   :  { %735 = dma.done.wait [#allocation4], 2048  }
 0x3ca   :  { %736 = vsyncadd [#allocation4], 4294965248 }
 0x3cb   :  { %495 = vsyncpa [#allocation3], 1 }
 0x3cc   :  { %496 = vsyncpa [#allocation6], 1 }
 0x3cd   :  { %497 = vsyncpa [#allocation9], 1 }
 0x3ce   :  { %498 = vsyncpa [#allocation4], 1 }

</bundles_post_ra>
